<compile_context>
chip_gen: v7x
topology: tpu7x:2x2x1
jax: 0.10.0
libtpu: 0.0.40
codegen_flags: <defaults>
</compile_context>

<pallas_src>
import functools

import jax
import jax.numpy as jnp
from jax.experimental import pallas as pl
from jax.experimental.pallas import tpu as pltpu

EPS = 1e-5  # nn.LayerNorm default


def _round_up(x, m):
    return ((x + m - 1) // m) * m


def _vmem_budget_bytes():
    """~75% of physical VMEM: 48 MiB on v7x (64 MiB), 96 MiB on v5e/v6e (128 MiB)."""
    cap = 64 * 1024 * 1024  # conservative fallback (v7x-sized)
    try:
        cap = int(pltpu.get_tpu_info().vmem_capacity_bytes)
    except Exception:
        pass
    return (3 * cap) // 4


def prenorm_linear_kernel(x_ref, w_ref, wcol_ref, b_ref, o_ref,
                          acc_ref, s_ref, ss_ref, *, d_model):
    # x_ref:    (TR, TK) raw input tile (rows x K-slice of the hidden dim)
    # w_ref:    (TK, DO) gamma-folded weight tile (resident when TK == D)
    # wcol_ref: (1,  DO) f32 column sums of the folded weight (= gamma @ W)
    # b_ref:    (1,  DO) f32 fused bias (= beta @ W + b)
    # o_ref:    (TR, DO) output tile
    # acc_ref:  (TR, DO) f32 accumulator of x @ W_eff
    # s_ref/ss_ref: (TR, 1) f32 running sum / sum-of-squares for LN stats
    k = pl.program_id(1)

    @pl.when(k == 0)
    def _init():
        acc_ref[...] = jnp.zeros_like(acc_ref)
        s_ref[...] = jnp.zeros_like(s_ref)
        ss_ref[...] = jnp.zeros_like(ss_ref)

    x = x_ref[...]
    xf = x.astype(jnp.float32)
    # One-pass LayerNorm statistics.
    s_ref[...] += jnp.sum(xf, axis=-1, keepdims=True)
    ss_ref[...] += jnp.sum(xf * xf, axis=-1, keepdims=True)

    # MXU operands in the weight dtype; accumulate in f32.
    acc_ref[...] += jnp.dot(x.astype(w_ref.dtype), w_ref[...],
                            preferred_element_type=jnp.float32)

    @pl.when(k == pl.num_programs(1) - 1)
    def _finalize():
        inv_d = 1.0 / d_model
        mean = s_ref[...] * inv_d                                   # (TR, 1)
        var = jnp.maximum(ss_ref[...] * inv_d - mean * mean, 0.0)   # biased var
        inv = jax.lax.rsqrt(var + EPS)
        # ((x - mean) * inv) @ W_eff == inv * (x @ W_eff - mean * colsum(W_eff))
        y = inv * (acc_ref[...] - mean * wcol_ref[...]) + b_ref[...]
        o_ref[...] = y.astype(o_ref.dtype)


def _choose_k_tile(d_in, d_out, wbytes, budget):
    # Keep the whole weight resident (TK == d_in) when it fits comfortably;
    # otherwise stream K-slices (double-buffered) over a second grid axis.
    if d_in % 128 != 0:
        return d_in  # TODO(synk): masked ragged-K path for d_in % 128 != 0
    if d_in * d_out * wbytes <= 0.4 * budget:   # resident -> single buffer
        return d_in
    for cand in range(d_in - 128, 0, -128):
        if d_in % cand == 0 and 2 * cand * d_out * wbytes <= 0.4 * budget:
            return cand
    return 128


def prenorm_linear(x, gamma, beta, w, b, *, row_tile=None, force_k_tile=None,
                   mxu_dtype=None):
    """PreNorm(dim, Linear(dim, d_out)): y = Linear(LayerNorm(x)).

    x: (B, N, D); gamma/beta: (D,); w: (D, D_out) laid out so y = xn @ w + b.
    (Not jitted on purpose: the single-buffer fallback below needs eager
    Mosaic lowering.  Wrap the *caller* in jax.jit for production use.)
    """
    B, N, D = x.shape
    assert w.ndim == 2 and w.shape[0] == D, (
        f"fn=Linear weight must be (D, D_out) with D={D}; got {w.shape}. "
        "Transpose PyTorch's (out,in) layout before calling.")
    D_out = w.shape[1]
    R = B * N
    x2 = x.reshape(R, D)

    # Fold the LayerNorm affine into the Linear (once, in f32).
    f32 = jnp.float32
    gamma_f = gamma.astype(f32)
    beta_f = beta.astype(f32)
    w_f = w.astype(f32)
    w_dtype = jnp.dtype(mxu_dtype) if mxu_dtype is not None else w.dtype
    w_eff = (gamma_f[:, None] * w_f).astype(w_dtype)      # (D, D_out)
    wcol = (gamma_f @ w_f).reshape(1, D_out)              # f32 colsum of w_eff
    b_eff = (beta_f @ w_f + b.astype(f32)).reshape(1, D_out)

    budget = _vmem_budget_bytes()
    xbytes = jnp.dtype(x.dtype).itemsize
    wbytes = jnp.dtype(w_dtype).itemsize

    TK = force_k_tile if force_k_tile is not None else _choose_k_tile(
        D, D_out, wbytes, budget)
    assert D % TK == 0, "K tile must divide the hidden dim"
    num_k = D // TK
    w_resident = (num_k == 1)

    def footprint(tr):
        nbuf_w = 1 if w_resident else 2
        return (2 * tr * TK * xbytes            # double-buffered x blocks
                + nbuf_w * TK * D_out * wbytes  # weight tile(s)
                + 2 * tr * D_out * xbytes       # double-buffered out blocks
                + tr * D_out * 4                # f32 matmul accumulator
                + 2 * tr * 4                    # LN stat scratch
                + 4 * D_out * 4                 # wcol / b_eff
                + 3 * tr * TK * 4               # f32 elementwise intermediates
                + 3 * tr * D_out * 4)           # f32 finalize intermediates

    if row_tile is None:
        # Larger default where 128 MiB VMEM allows (v5e/v6e); the fit loop
        # shrinks it for v7x / large D.
        row_tile = 1024 if budget >= 64 * 1024 * 1024 else 512

    if R < 8:
        TR = R
    else:
        # Target >= 8 row tiles so the "parallel" axis can be split across
        # TensorCores, but never below an 8-row sublane tile.
        target = max(8, _round_up(-(-R // 8), 8))
        TR = max(8, min(row_tile, target, _round_up(R, 8)))
        while TR > 8 and footprint(TR) > budget:
            TR = max(8, _round_up(TR // 2, 8))

    num_rows = -(-R // TR)
    grid = (num_rows, num_k)

    kernel = functools.partial(prenorm_linear_kernel, d_model=D)

    cost = pl.CostEstimate(
        flops=2 * R * D * D_out,
        transcendentals=R,                      # one rsqrt per row
        bytes_accessed=(R * D * xbytes + R * D_out * xbytes
                        + (num_rows if num_k > 1 else 1) * D * D_out * wbytes
                        + 2 * D_out * 4),
    )

    def run(single_buffer_consts):
        def const_spec(shape):
            if single_buffer_consts and hasattr(pl, "Buffered"):
                return pl.BlockSpec(shape, lambda i, k: (0, 0),
                                    pipeline_mode=pl.Buffered(1))
            return pl.BlockSpec(shape, lambda i, k: (0, 0))

        if w_resident:
            w_spec = const_spec((TK, D_out))
        else:
            w_spec = pl.BlockSpec((TK, D_out), lambda i, k: (k, 0))

        return pl.pallas_call(
            kernel,
            out_shape=jax.ShapeDtypeStruct((R, D_out), x.dtype),
            grid_spec=pltpu.PrefetchScalarGridSpec(
                num_scalar_prefetch=0,
                grid=grid,
                in_specs=[
                    pl.BlockSpec((TR, TK), lambda i, k: (i, k)),  # x (pipelined)
                    w_spec,                                       # folded weight
                    const_spec((1, D_out)),                       # wcol (resident)
                    const_spec((1, D_out)),                       # fused bias
                ],
                out_specs=pl.BlockSpec((TR, D_out), lambda i, k: (i, 0)),
                scratch_shapes=[
                    pltpu.VMEM((TR, D_out), jnp.float32),  # matmul accumulator
                    pltpu.VMEM((TR, 1), jnp.float32),      # running sum
                    pltpu.VMEM((TR, 1), jnp.float32),      # running sum of sq.
                ],
            ),
            compiler_params=pltpu.CompilerParams(
                dimension_semantics=("parallel", "arbitrary"),
                vmem_limit_bytes=budget,
            ),
            cost_estimate=cost,
        )(x2, w_eff, wcol, b_eff)

    try:
        out = run(True)
    except Exception:
        # pl.Buffered(1) not supported on this jax version -> default buffering.
        out = run(False)

    return out.reshape(B, N, D_out)


def prenorm_linear_ref(x, gamma, beta, w, b):
    xf = x.astype(jnp.float32)
    mean = jnp.mean(xf, axis=-1, keepdims=True)
    var = jnp.mean((xf - mean) ** 2, axis=-1, keepdims=True)
    xn = (xf - mean) / jnp.sqrt(var + EPS)
    xn = xn * gamma.astype(jnp.float32) + beta.astype(jnp.float32)
    y = xn @ w.astype(jnp.float32) + b.astype(jnp.float32)
    return y.astype(x.dtype)


if __name__ == "__main__":
    key = jax.random.PRNGKey(0)

    def make_inputs(k, D, D_out, B=2, N=8):
        k_x, k_g, k_bt, k_w, k_b = jax.random.split(k, 5)
        x = jax.random.normal(k_x, (B, N, D), dtype=jnp.float32)
        gamma = 1.0 + 0.1 * jax.random.normal(k_g, (D,), dtype=jnp.float32)
        beta = 0.1 * jax.random.normal(k_bt, (D,), dtype=jnp.float32)
        w = jax.random.normal(k_w, (D, D_out), dtype=jnp.float32) / jnp.sqrt(D)
        b = 0.1 * jax.random.normal(k_b, (D_out,), dtype=jnp.float32)
        return x, gamma, beta, w, b

    k1, k2 = jax.random.split(key)

    # Config 1: dim=128 -> weight fully VMEM-resident, single K step.
    x, gamma, beta, w, b = make_inputs(k1, 128, 128)
    y = prenorm_linear(x, gamma, beta, w, b)
    jax.block_until_ready(y)
    y_ref = prenorm_linear_ref(x, gamma, beta, w, b)
    assert y.shape == y_ref.shape
    assert jnp.allclose(y, y_ref, atol=2e-4, rtol=2e-4), \
        "mismatch vs reference (resident-weight path)"

    # Config 2: dim=256 with a forced K tile of 128 to exercise the K-tiled
    # accumulator path (pl.when init/finalize over the 'arbitrary' axis).
    x, gamma, beta, w, b = make_inputs(k2, 256, 256)
    y = prenorm_linear(x, gamma, beta, w, b, force_k_tile=128)
    jax.block_until_ready(y)
    y_ref = prenorm_linear_ref(x, gamma, beta, w, b)
    assert jnp.allclose(y, y_ref, atol=2e-4, rtol=2e-4), \
        "mismatch vs reference (K-tiled path)"

    print("KERNEL_OK")
</pallas_src>

<mosaic_0001>
module attributes {stable_mosaic.version = 11 : i64} {
  func.func @prenorm_linear_kernel(%arg0: i32, %arg1: i32, %arg2: memref<8x128xf32, #tpu.memory_space<vmem>>, %arg3: memref<128x128xf32, #tpu.memory_space<vmem>>, %arg4: memref<1x128xf32, #tpu.memory_space<vmem>>, %arg5: memref<1x128xf32, #tpu.memory_space<vmem>>, %arg6: memref<8x128xf32, #tpu.memory_space<vmem>>, %arg7: memref<8x128xf32, #tpu.memory_space<vmem>>, %arg8: memref<8x1xf32, #tpu.memory_space<vmem>>, %arg9: memref<8x1xf32, #tpu.memory_space<vmem>>) attributes {dimension_semantics = [#tpu.dimension_semantics<parallel>, #tpu.dimension_semantics<arbitrary>], iteration_bounds = array<i64: 2, 1>, scalar_prefetch = 0 : i64, scratch_operands = 3 : i64, tpu.core_type = #tpu.core_type<tc>, window_params = [{transform_indices = @transform_0, window_bounds = array<i64: 8, 128>}, {pipeline_mode = #tpu.pipeline_mode<synchronous>, transform_indices = @transform_1, window_bounds = array<i64: 128, 128>}, {pipeline_mode = #tpu.pipeline_mode<synchronous>, transform_indices = @transform_2, window_bounds = array<i64: 1, 128>}, {pipeline_mode = #tpu.pipeline_mode<synchronous>, transform_indices = @transform_3, window_bounds = array<i64: 1, 128>}, {transform_indices = @transform_4, window_bounds = array<i64: 8, 128>}]} {
    %c0_i32 = arith.constant 0 : i32
    %0 = arith.cmpi eq, %arg1, %c0_i32 : i32
    %1 = arith.extui %0 : i1 to i32
    %c0_i32_0 = arith.constant 0 : i32
    %2 = arith.cmpi ne, %1, %c0_i32_0 : i32
    scf.if %2 {
      %cst_20 = arith.constant 0.000000e+00 : f32
      %23 = vector.broadcast %cst_20 : f32 to vector<8x128xf32>
      %c0_21 = arith.constant 0 : index
      %c0_22 = arith.constant 0 : index
      %24 = vector.load %arg7[%c0_21, %c0_22] : memref<8x128xf32, #tpu.memory_space<vmem>>, vector<8x128xf32>
      tpu.vector_store %arg7[%c0_21, %c0_22], %23 {strides = array<i32>} : memref<8x128xf32, #tpu.memory_space<vmem>>, vector<8x128xf32>,
      %cst_23 = arith.constant 0.000000e+00 : f32
      %25 = vector.broadcast %cst_23 : f32 to vector<8x1xf32>
      %c0_24 = arith.constant 0 : index
      %c0_25 = arith.constant 0 : index
      %26 = vector.load %arg8[%c0_24, %c0_25] : memref<8x1xf32, #tpu.memory_space<vmem>>, vector<8x1xf32>
      tpu.vector_store %arg8[%c0_24, %c0_25], %25 {strides = array<i32>} : memref<8x1xf32, #tpu.memory_space<vmem>>, vector<8x1xf32>,
      %cst_26 = arith.constant 0.000000e+00 : f32
      %27 = vector.broadcast %cst_26 : f32 to vector<8x1xf32>
      %c0_27 = arith.constant 0 : index
      %c0_28 = arith.constant 0 : index
      %28 = vector.load %arg9[%c0_27, %c0_28] : memref<8x1xf32, #tpu.memory_space<vmem>>, vector<8x1xf32>
      tpu.vector_store %arg9[%c0_27, %c0_28], %27 {strides = array<i32>} : memref<8x1xf32, #tpu.memory_space<vmem>>, vector<8x1xf32>,
    } else {
    }
    %c0 = arith.constant 0 : index
    %c0_1 = arith.constant 0 : index
    %3 = vector.load %arg2[%c0, %c0_1] : memref<8x128xf32, #tpu.memory_space<vmem>>, vector<8x128xf32>
    %c0_2 = arith.constant 0 : index
    %c0_3 = arith.constant 0 : index
    %4 = vector.load %arg8[%c0_2, %c0_3] : memref<8x1xf32, #tpu.memory_space<vmem>>, vector<8x1xf32>
    %cst = arith.constant dense<0.000000e+00> : vector<8xf32>
    %5 = vector.multi_reduction <add>, %3, %cst [1] : vector<8x128xf32> to vector<8xf32>
    %6 = vector.shape_cast %5 : vector<8xf32> to vector<8x1xf32>
    %7 = arith.addf %4, %6 : vector<8x1xf32>
    %c0_4 = arith.constant 0 : index
    %c0_5 = arith.constant 0 : index
    %8 = vector.load %arg8[%c0_4, %c0_5] : memref<8x1xf32, #tpu.memory_space<vmem>>, vector<8x1xf32>
    tpu.vector_store %arg8[%c0_4, %c0_5], %7 {strides = array<i32>} : memref<8x1xf32, #tpu.memory_space<vmem>>, vector<8x1xf32>,
    %c0_6 = arith.constant 0 : index
    %c0_7 = arith.constant 0 : index
    %9 = vector.load %arg9[%c0_6, %c0_7] : memref<8x1xf32, #tpu.memory_space<vmem>>, vector<8x1xf32>
    %10 = arith.mulf %3, %3 : vector<8x128xf32>
    %cst_8 = arith.constant dense<0.000000e+00> : vector<8xf32>
    %11 = vector.multi_reduction <add>, %10, %cst_8 [1] : vector<8x128xf32> to vector<8xf32>
    %12 = vector.shape_cast %11 : vector<8xf32> to vector<8x1xf32>
    %13 = arith.addf %9, %12 : vector<8x1xf32>
    %c0_9 = arith.constant 0 : index
    %c0_10 = arith.constant 0 : index
    %14 = vector.load %arg9[%c0_9, %c0_10] : memref<8x1xf32, #tpu.memory_space<vmem>>, vector<8x1xf32>
    tpu.vector_store %arg9[%c0_9, %c0_10], %13 {strides = array<i32>} : memref<8x1xf32, #tpu.memory_space<vmem>>, vector<8x1xf32>,
    %c0_11 = arith.constant 0 : index
    %c0_12 = arith.constant 0 : index
    %15 = vector.load %arg7[%c0_11, %c0_12] : memref<8x128xf32, #tpu.memory_space<vmem>>, vector<8x128xf32>
    %c0_13 = arith.constant 0 : index
    %c0_14 = arith.constant 0 : index
    %16 = vector.load %arg3[%c0_13, %c0_14] : memref<128x128xf32, #tpu.memory_space<vmem>>, vector<128x128xf32>
    %cst_15 = arith.constant dense<0.000000e+00> : vector<8x128xf32>
    %17 = tpu.matmul %3, %16, %cst_15 {dimension_numbers = #tpu.dot_dimension_numbers<[1], [0], [0], [1], [0, 0, 1, 1], [], []>} : vector<8x128xf32>, vector<128x128xf32>, vector<8x128xf32> -> vector<8x128xf32>
    %18 = arith.addf %15, %17 : vector<8x128xf32>
    %c0_16 = arith.constant 0 : index
    %c0_17 = arith.constant 0 : index
    %19 = vector.load %arg7[%c0_16, %c0_17] : memref<8x128xf32, #tpu.memory_space<vmem>>, vector<8x128xf32>
    tpu.vector_store %arg7[%c0_16, %c0_17], %18 {strides = array<i32>} : memref<8x128xf32, #tpu.memory_space<vmem>>, vector<8x128xf32>,
    %c0_i32_18 = arith.constant 0 : i32
    %20 = arith.cmpi eq, %arg1, %c0_i32_18 : i32
    %21 = arith.extui %20 : i1 to i32
    %c0_i32_19 = arith.constant 0 : i32
    %22 = arith.cmpi ne, %21, %c0_i32_19 : i32
    scf.if %22 {
      %c0_20 = arith.constant 0 : index
      %c0_21 = arith.constant 0 : index
      %23 = vector.load %arg8[%c0_20, %c0_21] : memref<8x1xf32, #tpu.memory_space<vmem>>, vector<8x1xf32>
      %cst_22 = arith.constant 7.812500e-03 : f32
      %24 = vector.broadcast %cst_22 : f32 to vector<8x1xf32>
      %25 = arith.mulf %23, %24 : vector<8x1xf32>
      %c0_23 = arith.constant 0 : index
      %c0_24 = arith.constant 0 : index
      %26 = vector.load %arg9[%c0_23, %c0_24] : memref<8x1xf32, #tpu.memory_space<vmem>>, vector<8x1xf32>
      %cst_25 = arith.constant 7.812500e-03 : f32
      %27 = vector.broadcast %cst_25 : f32 to vector<8x1xf32>
      %28 = arith.mulf %26, %27 : vector<8x1xf32>
      %29 = arith.mulf %25, %25 : vector<8x1xf32>
      %30 = arith.subf %28, %29 : vector<8x1xf32>
      %cst_26 = arith.constant 0.000000e+00 : f32
      %31 = vector.broadcast %cst_26 : f32 to vector<8x1xf32>
      %32 = arith.maximumf %30, %31 : vector<8x1xf32>
      %cst_27 = arith.constant 9.99999974E-6 : f32
      %33 = vector.broadcast %cst_27 : f32 to vector<8x1xf32>
      %34 = arith.addf %32, %33 : vector<8x1xf32>
      %35 = math.rsqrt %34 : vector<8x1xf32>
      %c0_28 = arith.constant 0 : index
      %c0_29 = arith.constant 0 : index
      %36 = vector.load %arg7[%c0_28, %c0_29] : memref<8x128xf32, #tpu.memory_space<vmem>>, vector<8x128xf32>
      %c0_30 = arith.constant 0 : index
      %c0_31 = arith.constant 0 : index
      %37 = vector.load %arg4[%c0_30, %c0_31] : memref<1x128xf32, #tpu.memory_space<vmem>>, vector<1x128xf32>
      %38 = vector.broadcast %25 : vector<8x1xf32> to vector<8x128xf32>
      %39 = vector.broadcast %37 : vector<1x128xf32> to vector<8x128xf32>
      %40 = arith.mulf %38, %39 : vector<8x128xf32>
      %41 = arith.subf %36, %40 : vector<8x128xf32>
      %42 = vector.broadcast %35 : vector<8x1xf32> to vector<8x128xf32>
      %43 = arith.mulf %42, %41 : vector<8x128xf32>
      %c0_32 = arith.constant 0 : index
      %c0_33 = arith.constant 0 : index
      %44 = vector.load %arg5[%c0_32, %c0_33] : memref<1x128xf32, #tpu.memory_space<vmem>>, vector<1x128xf32>
      %45 = vector.broadcast %44 : vector<1x128xf32> to vector<8x128xf32>
      %46 = arith.addf %43, %45 : vector<8x128xf32>
      %c0_34 = arith.constant 0 : index
      %c0_35 = arith.constant 0 : index
      %47 = vector.load %arg6[%c0_34, %c0_35] : memref<8x128xf32, #tpu.memory_space<vmem>>, vector<8x128xf32>
      tpu.vector_store %arg6[%c0_34, %c0_35], %46 {strides = array<i32>} : memref<8x128xf32, #tpu.memory_space<vmem>>, vector<8x128xf32>,
    } else {
    }
    return
  }
  func.func @transform_0(%arg0: i32, %arg1: i32) -> (i32, i32) {
    %c0_i32 = arith.constant 0 : i32
    return %arg0, %arg1 : i32, i32
  }
  func.func @transform_1(%arg0: i32, %arg1: i32) -> (i32, i32) {
    %c0_i32 = arith.constant 0 : i32
    %c0_i32_0 = arith.constant 0 : i32
    %c0_i32_1 = arith.constant 0 : i32
    return %c0_i32, %c0_i32_0 : i32, i32
  }
  func.func @transform_2(%arg0: i32, %arg1: i32) -> (i32, i32) {
    %c0_i32 = arith.constant 0 : i32
    %c0_i32_0 = arith.constant 0 : i32
    %c0_i32_1 = arith.constant 0 : i32
    return %c0_i32, %c0_i32_0 : i32, i32
  }
  func.func @transform_3(%arg0: i32, %arg1: i32) -> (i32, i32) {
    %c0_i32 = arith.constant 0 : i32
    %c0_i32_0 = arith.constant 0 : i32
    %c0_i32_1 = arith.constant 0 : i32
    return %c0_i32, %c0_i32_0 : i32, i32
  }
  func.func @transform_4(%arg0: i32, %arg1: i32) -> (i32, i32) {
    %c0_i32 = arith.constant 0 : i32
    %c0_i32_0 = arith.constant 0 : i32
    return %arg0, %c0_i32 : i32, i32
  }
}

module attributes {stable_mosaic.version = 11 : i64} {
  func.func @prenorm_linear_kernel(%arg0: i32, %arg1: i32, %arg2: memref<8x128xf32, #tpu.memory_space<vmem>>, %arg3: memref<128x128xf32, #tpu.memory_space<vmem>>, %arg4: memref<1x128xf32, #tpu.memory_space<vmem>>, %arg5: memref<1x128xf32, #tpu.memory_space<vmem>>, %arg6: memref<8x128xf32, #tpu.memory_space<vmem>>, %arg7: memref<8x128xf32, #tpu.memory_space<vmem>>, %arg8: memref<8x1xf32, #tpu.memory_space<vmem>>, %arg9: memref<8x1xf32, #tpu.memory_space<vmem>>) attributes {dimension_semantics = [#tpu.dimension_semantics<parallel>, #tpu.dimension_semantics<arbitrary>], iteration_bounds = array<i64: 2, 1>, scalar_prefetch = 0 : i64, scratch_operands = 3 : i64, tpu.core_type = #tpu.core_type<tc>, window_params = [{transform_indices = @transform_0, window_bounds = array<i64: 8, 128>}, {pipeline_mode = #tpu.pipeline_mode<synchronous>, transform_indices = @transform_1, window_bounds = array<i64: 128, 128>}, {pipeline_mode = #tpu.pipeline_mode<synchronous>, transform_indices = @transform_2, window_bounds = array<i64: 1, 128>}, {pipeline_mode = #tpu.pipeline_mode<synchronous>, transform_indices = @transform_3, window_bounds = array<i64: 1, 128>}, {transform_indices = @transform_4, window_bounds = array<i64: 8, 128>}]} {
    %c0_i32 = arith.constant 0 : i32
    %0 = arith.cmpi eq, %arg1, %c0_i32 : i32
    %1 = arith.extui %0 : i1 to i32
    %c0_i32_0 = arith.constant 0 : i32
    %2 = arith.cmpi ne, %1, %c0_i32_0 : i32
    scf.if %2 {
      %cst_20 = arith.constant 0.000000e+00 : f32
      %23 = vector.broadcast %cst_20 : f32 to vector<8x128xf32>
      %c0_21 = arith.constant 0 : index
      %c0_22 = arith.constant 0 : index
      %24 = vector.load %arg7[%c0_21, %c0_22] : memref<8x128xf32, #tpu.memory_space<vmem>>, vector<8x128xf32>
      tpu.vector_store %arg7[%c0_21, %c0_22], %23 {strides = array<i32>} : memref<8x128xf32, #tpu.memory_space<vmem>>, vector<8x128xf32>,
      %cst_23 = arith.constant 0.000000e+00 : f32
      %25 = vector.broadcast %cst_23 : f32 to vector<8x1xf32>
      %c0_24 = arith.constant 0 : index
      %c0_25 = arith.constant 0 : index
      %26 = vector.load %arg8[%c0_24, %c0_25] : memref<8x1xf32, #tpu.memory_space<vmem>>, vector<8x1xf32>
      tpu.vector_store %arg8[%c0_24, %c0_25], %25 {strides = array<i32>} : memref<8x1xf32, #tpu.memory_space<vmem>>, vector<8x1xf32>,
      %cst_26 = arith.constant 0.000000e+00 : f32
      %27 = vector.broadcast %cst_26 : f32 to vector<8x1xf32>
      %c0_27 = arith.constant 0 : index
      %c0_28 = arith.constant 0 : index
      %28 = vector.load %arg9[%c0_27, %c0_28] : memref<8x1xf32, #tpu.memory_space<vmem>>, vector<8x1xf32>
      tpu.vector_store %arg9[%c0_27, %c0_28], %27 {strides = array<i32>} : memref<8x1xf32, #tpu.memory_space<vmem>>, vector<8x1xf32>,
    } else {
    }
    %c0 = arith.constant 0 : index
    %c0_1 = arith.constant 0 : index
    %3 = vector.load %arg2[%c0, %c0_1] : memref<8x128xf32, #tpu.memory_space<vmem>>, vector<8x128xf32>
    %c0_2 = arith.constant 0 : index
    %c0_3 = arith.constant 0 : index
    %4 = vector.load %arg8[%c0_2, %c0_3] : memref<8x1xf32, #tpu.memory_space<vmem>>, vector<8x1xf32>
    %cst = arith.constant dense<0.000000e+00> : vector<8xf32>
    %5 = vector.multi_reduction <add>, %3, %cst [1] : vector<8x128xf32> to vector<8xf32>
    %6 = vector.shape_cast %5 : vector<8xf32> to vector<8x1xf32>
    %7 = arith.addf %4, %6 : vector<8x1xf32>
    %c0_4 = arith.constant 0 : index
    %c0_5 = arith.constant 0 : index
    %8 = vector.load %arg8[%c0_4, %c0_5] : memref<8x1xf32, #tpu.memory_space<vmem>>, vector<8x1xf32>
    tpu.vector_store %arg8[%c0_4, %c0_5], %7 {strides = array<i32>} : memref<8x1xf32, #tpu.memory_space<vmem>>, vector<8x1xf32>,
    %c0_6 = arith.constant 0 : index
    %c0_7 = arith.constant 0 : index
    %9 = vector.load %arg9[%c0_6, %c0_7] : memref<8x1xf32, #tpu.memory_space<vmem>>, vector<8x1xf32>
    %10 = arith.mulf %3, %3 : vector<8x128xf32>
    %cst_8 = arith.constant dense<0.000000e+00> : vector<8xf32>
    %11 = vector.multi_reduction <add>, %10, %cst_8 [1] : vector<8x128xf32> to vector<8xf32>
    %12 = vector.shape_cast %11 : vector<8xf32> to vector<8x1xf32>
    %13 = arith.addf %9, %12 : vector<8x1xf32>
    %c0_9 = arith.constant 0 : index
    %c0_10 = arith.constant 0 : index
    %14 = vector.load %arg9[%c0_9, %c0_10] : memref<8x1xf32, #tpu.memory_space<vmem>>, vector<8x1xf32>
    tpu.vector_store %arg9[%c0_9, %c0_10], %13 {strides = array<i32>} : memref<8x1xf32, #tpu.memory_space<vmem>>, vector<8x1xf32>,
    %c0_11 = arith.constant 0 : index
    %c0_12 = arith.constant 0 : index
    %15 = vector.load %arg7[%c0_11, %c0_12] : memref<8x128xf32, #tpu.memory_space<vmem>>, vector<8x128xf32>
    %c0_13 = arith.constant 0 : index
    %c0_14 = arith.constant 0 : index
    %16 = vector.load %arg3[%c0_13, %c0_14] : memref<128x128xf32, #tpu.memory_space<vmem>>, vector<128x128xf32>
    %cst_15 = arith.constant dense<0.000000e+00> : vector<8x128xf32>
    %17 = tpu.matmul %3, %16, %cst_15 {dimension_numbers = #tpu.dot_dimension_numbers<[1], [0], [0], [1], [0, 0, 1, 1], [], []>} : vector<8x128xf32>, vector<128x128xf32>, vector<8x128xf32> -> vector<8x128xf32>
    %18 = arith.addf %15, %17 : vector<8x128xf32>
    %c0_16 = arith.constant 0 : index
    %c0_17 = arith.constant 0 : index
    %19 = vector.load %arg7[%c0_16, %c0_17] : memref<8x128xf32, #tpu.memory_space<vmem>>, vector<8x128xf32>
    tpu.vector_store %arg7[%c0_16, %c0_17], %18 {strides = array<i32>} : memref<8x128xf32, #tpu.memory_space<vmem>>, vector<8x128xf32>,
    %c0_i32_18 = arith.constant 0 : i32
    %20 = arith.cmpi eq, %arg1, %c0_i32_18 : i32
    %21 = arith.extui %20 : i1 to i32
    %c0_i32_19 = arith.constant 0 : i32
    %22 = arith.cmpi ne, %21, %c0_i32_19 : i32
    scf.if %22 {
      %c0_20 = arith.constant 0 : index
      %c0_21 = arith.constant 0 : index
      %23 = vector.load %arg8[%c0_20, %c0_21] : memref<8x1xf32, #tpu.memory_space<vmem>>, vector<8x1xf32>
      %cst_22 = arith.constant 7.812500e-03 : f32
      %24 = vector.broadcast %cst_22 : f32 to vector<8x1xf32>
      %25 = arith.mulf %23, %24 : vector<8x1xf32>
      %c0_23 = arith.constant 0 : index
      %c0_24 = arith.constant 0 : index
      %26 = vector.load %arg9[%c0_23, %c0_24] : memref<8x1xf32, #tpu.memory_space<vmem>>, vector<8x1xf32>
      %cst_25 = arith.constant 7.812500e-03 : f32
      %27 = vector.broadcast %cst_25 : f32 to vector<8x1xf32>
      %28 = arith.mulf %26, %27 : vector<8x1xf32>
      %29 = arith.mulf %25, %25 : vector<8x1xf32>
      %30 = arith.subf %28, %29 : vector<8x1xf32>
      %cst_26 = arith.constant 0.000000e+00 : f32
      %31 = vector.broadcast %cst_26 : f32 to vector<8x1xf32>
      %32 = arith.maximumf %30, %31 : vector<8x1xf32>
      %cst_27 = arith.constant 9.99999974E-6 : f32
      %33 = vector.broadcast %cst_27 : f32 to vector<8x1xf32>
      %34 = arith.addf %32, %33 : vector<8x1xf32>
      %35 = math.rsqrt %34 : vector<8x1xf32>
      %c0_28 = arith.constant 0 : index
      %c0_29 = arith.constant 0 : index
      %36 = vector.load %arg7[%c0_28, %c0_29] : memref<8x128xf32, #tpu.memory_space<vmem>>, vector<8x128xf32>
      %c0_30 = arith.constant 0 : index
      %c0_31 = arith.constant 0 : index
      %37 = vector.load %arg4[%c0_30, %c0_31] : memref<1x128xf32, #tpu.memory_space<vmem>>, vector<1x128xf32>
      %38 = vector.broadcast %25 : vector<8x1xf32> to vector<8x128xf32>
      %39 = vector.broadcast %37 : vector<1x128xf32> to vector<8x128xf32>
      %40 = arith.mulf %38, %39 : vector<8x128xf32>
      %41 = arith.subf %36, %40 : vector<8x128xf32>
      %42 = vector.broadcast %35 : vector<8x1xf32> to vector<8x128xf32>
      %43 = arith.mulf %42, %41 : vector<8x128xf32>
      %c0_32 = arith.constant 0 : index
      %c0_33 = arith.constant 0 : index
      %44 = vector.load %arg5[%c0_32, %c0_33] : memref<1x128xf32, #tpu.memory_space<vmem>>, vector<1x128xf32>
      %45 = vector.broadcast %44 : vector<1x128xf32> to vector<8x128xf32>
      %46 = arith.addf %43, %45 : vector<8x128xf32>
      %c0_34 = arith.constant 0 : index
      %c0_35 = arith.constant 0 : index
      %47 = vector.load %arg6[%c0_34, %c0_35] : memref<8x128xf32, #tpu.memory_space<vmem>>, vector<8x128xf32>
      tpu.vector_store %arg6[%c0_34, %c0_35], %46 {strides = array<i32>} : memref<8x128xf32, #tpu.memory_space<vmem>>, vector<8x128xf32>,
    } else {
    }
    return
  }
  func.func @transform_0(%arg0: i32, %arg1: i32) -> (i32, i32) {
    %c0_i32 = arith.constant 0 : i32
    return %arg0, %arg1 : i32, i32
  }
  func.func @transform_1(%arg0: i32, %arg1: i32) -> (i32, i32) {
    %c0_i32 = arith.constant 0 : i32
    %c0_i32_0 = arith.constant 0 : i32
    %c0_i32_1 = arith.constant 0 : i32
    return %c0_i32, %c0_i32_0 : i32, i32
  }
  func.func @transform_2(%arg0: i32, %arg1: i32) -> (i32, i32) {
    %c0_i32 = arith.constant 0 : i32
    %c0_i32_0 = arith.constant 0 : i32
    %c0_i32_1 = arith.constant 0 : i32
    return %c0_i32, %c0_i32_0 : i32, i32
  }
  func.func @transform_3(%arg0: i32, %arg1: i32) -> (i32, i32) {
    %c0_i32 = arith.constant 0 : i32
    %c0_i32_0 = arith.constant 0 : i32
    %c0_i32_1 = arith.constant 0 : i32
    return %c0_i32, %c0_i32_0 : i32, i32
  }
  func.func @transform_4(%arg0: i32, %arg1: i32) -> (i32, i32) {
    %c0_i32 = arith.constant 0 : i32
    %c0_i32_0 = arith.constant 0 : i32
    return %arg0, %c0_i32 : i32, i32
  }
}

</mosaic_0001>

<bundles_post_ra>
// kernel: tpu_custom_call.1
= control target key start
LH: loop header
LB: loop body
LE: loop exit
PB: predicated region body
PF: predicated region fallthrough
CT: control target
= control target key end

     0   :  { %9 = vsyncpa [#allocation6], 0  ;;  %s1082_s0 = inlined_call_operand.hbm [shape: f32[16,128], index: 0, kind: input, shape index: {}]   ;;  %s1083_s1 = inlined_call_operand.hbm [shape: f32[128,128], index: 1, kind: input, shape index: {}]   ;;  %s1084_s2 = inlined_call_operand.vmem [shape: f32[1,128], index: 2, kind: input, shape index: {}]   ;;  %s1085_s3 = inlined_call_operand.vmem [shape: f32[1,128], index: 3, kind: input, shape index: {}]   ;;  %s1086_s4 = inlined_call_operand.hbm [shape: f32[16,128], index: 4, kind: output, shape index: {}]  }
   0x1   :  { %11 = vsyncpa [#allocation6 + $0x1], 0 }
   0x2   :  { %12 = vsyncpa [#allocation9], 0 }
   0x3   :  { %13 = vsyncpa [#allocation7], 0 }
   0x4   :  { %15 = vsyncpa [#allocation7 + $0x1], 0  ;;  %s854_s15 = smov 0   ;;  %s856_s16 = smov 0  }
   0x5   :  { %s858_s17 = smov 0   ;;  %s860_s18 = smov 0  }
   0x6   :  { %s862_s19 = smov 0   ;;  %s864_s20 = smov 0  }
   0x7 LB: > { %s498_s21 = sadd.s32 4294967295, %s818_s20   ;;  %s499_s22 = sadd.s32 4294967294, %s818_s20   ;;  %s818_s20 = sphi %s864_s20, %s21_s20   ;;  %s814_s19 = sphi %s862_s19, %s1110_s19   ;;  %s810_s18 = sphi %s860_s18, %s1109_s18   ;;  %s806_s17 = sphi %s858_s17, %s1108_s17   ;;  %s802_s16 = sphi %s856_s16, %s1107_s16   ;;  %s798_s15 = sphi %s854_s15, %s1106_s15  }
   0x8   : > { %p55_p0 = scmp.ne.s32.totalorder %s802_s16, %s798_s15  ;;  %p888_p1 = scmp.eq.s32.totalorder %s498_s21, 0 }
   0x9   : > { %p892_p2 = scmp.eq.s32.totalorder %s498_s21, 1  ;;  %p148_p3 = scmp.eq.s32.totalorder %s499_s22, 1 }
   0xa   : > { %s1091_s23 = scalar_select %p888_p1, 1, 0 }
   0xb   : > { %s1092_s24 = scalar_select %p892_p2, 1, 0 }
   0xc   : > { %p898_p4 = por %p888_p1, %p55_p0  ;;  %p500_p5 = scmp.ge.s32.totalorder %s818_s20, 1 }
   0xd   : > { %p903_p6 = por %p148_p3, %p55_p0  ;;  %p155_p7 = scmp.lt.s32.totalorder %s818_s20, 3 }
   0xe   : > { %s1093_s25 = scalar_select %p898_p4, 1, 0 }
   0xf   : > { %s1094_s26 = scalar_select %p903_p6, 1, 0 }
  0x10   : > { %p908_p8 = pnand %p500_p5, %p155_p7  ;;  %s820_s28 = smov [#allocation8]  }
  0x11   : > { %s167_s29 = sshll.u32 %s820_s28, 4  ;;  %s33_s5 = sadd.s32 1, %s814_s19  ;;  %s168_s29 = int_to_ptr.vmem [resolvable:$true] %s167_s29 }
  0x12   : > { %s1095_s27 = scalar_select %p908_p8, 1, 0 }
  0x13   : > { %p599_p9 = pneg %p908_p8  ;;  %s674_s8 = scalar_lea.hbm %s1083_s1, 2048 }
  0x14   : > { %p675_p12 = scmp.ne.s32.totalorder %s1083_s1, %s674_s8  ;;  %p681_p5 = scmp.lt.u32.totalorder %s674_s8, %s1083_s1 }
  0x15   : > { %p917_p11 = pnand %p599_p9, %p888_p1 }
  0x17   : > { %p676_p13 = pneg %p917_p11 }
  0x19   : > { %p677_p0 = pnand %p676_p13, %p675_p12 }
  0x1b   : > { %p678_p3 = pneg %p677_p0 }
  0x1d   : > { %p683_p7 = pnand %p681_p5, %p678_p3 }
  0x1f   : > { %686 = shalt.err (!%p683_p7)
}
  0x20   : > { %s687_s13 = scalar_lea.vmem %s168_s29, 2048  ;;  %p695_p1 = scmp.lt.s32.totalorder %s168_s29, %s168_s29 }
  0x21   : > { %p688_p9 = scmp.ne.s32.totalorder %s168_s29, %s687_s13  ;;  %p696_p4 = scmp.lt.s32.totalorder %s687_s13, %s687_s13 }
  0x23   : > { %p690_p10 = pnand %p688_p9, %p676_p13  ;;  %p697_p8 = por %p696_p4, %p695_p1 }
  0x25   : > { %p691_p6 = pneg %p690_p10 }
  0x27   : > { %p698_p2 = pnand %p697_p8, %p691_p6 }
  0x29   : > { %701 = shalt.err (!%p698_p2)
}
  0x2a   : > { %s821_s14 = smov 128   ;;  %s822_s21 = smov 8  }
  0x2b   : > { %602 = dma.hbm_to_vmem [thread:$0]  (!%p917_p11), %s1083_s1, 2048, %s168_s29, [#allocation9], %s821_s14, %s821_s14, %s822_s21  }
  0x2c   : > { %p35_p1 = scmp.ge.s32.totalorder %s33_s5, 2  ;;  %s42_s6 = sadd.s32 1, %s806_s17 }
  0x2d   : > { %p49_p2 = scmp.ne.s32.totalorder %s806_s17, %s802_s16  ;;  %p50_p4 = scmp.eq.s32.totalorder %s818_s20, 0 }
  0x2e   : > { %s1112_s5 = smov (%p35_p1, %s33_s5), 0  ;;  %p1098_p8 = scmp.ne.s32.totalorder %s1092_s24, 0 }
  0x2f   : > { %p944_p6 = por %p50_p4, %p49_p2  ;;  %s37_s30 = ssub.s32 %s814_s19, %s1112_s5 }
  0x30   : > { %p950_p10 = por %p1098_p8, %p49_p2  ;;  %p612_p12 = scmp.lt.s32.totalorder %s818_s20, 2 }
  0x31   : > { %p40_p11 = scmp.eq.s32.totalorder %s37_s30, 0  ;;  %s187_s29 = sand.u32 1, %s806_s17  }
  0x32   : > { %s503_s9 = sshll.u32 %s187_s29, 3  ;;  %s504_s11 = sshll.u32 %s814_s19, 7 }
  0x33   : > { %s959_s10 = scalar_select %p40_p11, %s806_s17, %s42_s6  }
  0x34   : > { %s965_s14 = scalar_lea.hbm %s1082_s0, %s504_s11  ;;  %s191_s24 = scalar_lea.vmem [#allocation5], %s503_s9 }
  0x35   : > { %s199_s21 = sshll.u32 %s191_s24, 4  ;;  %p971_p13 = pnand %p612_p12, %p944_p6  ;;  %s967_s21 = int_to_ptr.vmem [resolvable:$true] %s199_s21 }
  0x36   : > { %s188_s28 = scalar_lea.sflag [#allocation6], %s187_s29  ;;  %s702_s6 = scalar_lea.hbm %s965_s14, 128 }
  0x37   : > { %p703_p0 = scmp.ne.s32.totalorder %s965_s14, %s702_s6  ;;  %p704_p3 = pneg %p971_p13 }
  0x38   : > { %s707_s11 = scalar_lea.hbm %s1082_s0, 256  ;;  %p708_p9 = scmp.lt.u32.totalorder %s965_s14, %s1082_s0 }
  0x39   : > { %p705_p5 = pnand %p704_p3, %p703_p0  ;;  %p709_p1 = scmp.lt.u32.totalorder %s707_s11, %s702_s6 }
  0x3a   : > { %p711_p4 = scmp.lt.u32.totalorder %s702_s6, %s965_s14 }
  0x3b   : > { %p706_p7 = pneg %p705_p5  ;;  %p710_p2 = por %p709_p1, %p708_p9 }
  0x3d   : > { %p712_p6 = por %p711_p4, %p710_p2 }
  0x3f   : > { %p713_p8 = pnand %p712_p6, %p706_p7 }
  0x41   : > { %716 = shalt.err (!%p713_p8)
}
  0x42   : > { %s717_s29 = scalar_lea.vmem %s967_s21, 128  ;;  %s823_s13 = smov [#allocation5]  }
  0x43   : > { %p718_p12 = scmp.ne.s32.totalorder %s967_s21, %s717_s29  ;;  %s722_s24 = sshll.u32 %s823_s13, 4  ;;  %s723_s24 = int_to_ptr.vmem [resolvable:$false] %s722_s24 }
  0x44   : > { %s724_s30 = scalar_lea.vmem %s723_s24, 256  ;;  %p725_p5 = scmp.lt.s32.totalorder %s967_s21, %s723_s24 }
  0x45   : > { %p720_p11 = pnand %p718_p12, %p704_p3  ;;  %p726_p9 = scmp.lt.s32.totalorder %s724_s30, %s717_s29 }
  0x47   : > { %p721_p0 = pneg %p720_p11  ;;  %p727_p1 = por %p726_p9, %p725_p5 }
  0x49   : > { %p728_p2 = pnand %p727_p1, %p721_p0 }
  0x4b   : > { %731 = shalt.err (!%p728_p2)
}
  0x4c   : > { %606 = dma.hbm_to_vmem [thread:$0]  (!%p971_p13), %s965_s14, 128, %s967_s21, %s188_s28  }
  0x4d   : > { %p1101_p7 = scmp.ne.s32.totalorder %s1095_s27, 0 }
  0x4e   : > { %s1003_s6 = sand.u32 (!%p1101_p7), 1, %s802_s16   ;;  %p1102_p3 = scmp.ne.s32.totalorder (!%p1101_p7), %s1093_s25, 0 }
  0x4f   : > { %208 = sbr.rel (%p1101_p7) target bundleno = 413 (0x19d), region = 36  ;;  %s506_s9 = sshll.u32 (!%p1101_p7), %s1003_s6, 3 }
  0x50   : > { %s211_s11 = scalar_lea.sflag (!%p1101_p7), [#allocation6], %s1003_s6  ;;  %s214_s7 = scalar_lea.vmem (!%p1101_p7), [#allocation5], %s506_s9 }
  0x56   : > { %785 = dma.done.wait (%p1102_p3), %s211_s11, 128  }
  0x57   : > { %787 = vsyncadd (%p1102_p3), %s211_s11, 4294967168  ;;  %p1103_p13 = scmp.ne.s32.totalorder %s1091_s23, 0 }
  0x59   : > { %789 = dma.done.wait (%p1103_p13), [#allocation9], 2048  }
  0x5a   : > { %791 = vsyncadd (%p1103_p13), [#allocation9], 4294965248  ;;  %vm248_vm0 = vcmask 7168   ;;  %v824_v0 = vmov 0.0|0.0   ;;  %v825_v1 = vmov 0.0   ;;  %vm826_vm1 = vmmov 0  }
  0x5b   : > { %567 = vmatprep.subr.bf16.mxu0 %v824_v0  ;;  %249 = vst.msk [vmem:[#allocation3] sm:$0xff] %vm248_vm0, %v825_v1  ;;  %250 = vst.msk [vmem:[#allocation4] sm:$0xff] %vm248_vm0, %v825_v1  ;;  %564 = vmatprep.mubr.msk.f32.mxu0 %vm826_vm1, %v825_v1  ;;  %v251_v2 = vld [vmem:[%s214_s7] sm:$0xff]  ;;  %v265_v3 = vld [vmem:[#allocation8] sm:$0xff]  ;;  %v827_v24 = vmov 0   ;;  %s512_s21 = sshll.u32 %s810_s18, 7 }
  0x5c   : > { %v266_v4 = vld [vmem:[#allocation8 + $0x8] sm:$0xff]  ;;  %253 = vadd.xlane.f32.xlu0 %v251_v2  ;;  %v259_v5 = vmul.f32 %v251_v2, %v251_v2  ;;  %v267_v7 = vld [vmem:[#allocation8 + $0x10] sm:$0xff]  ;;  %v268_v8 = vld [vmem:[#allocation8 + $0x18] sm:$0xff]  ;;  %670 = vset.pattern.permute.xlu1 %v827_v24  ;;  %s242_s22 = scalar_lea.vmem [#allocation10], %s506_s9  ;;  %s1033_s13 = scalar_lea.hbm %s1086_s4, %s512_s21 }
  0x5d   : > { %v568_v6 = vpack.c.bf16 %v266_v4, %v265_v3  ;;  %v571_v9 = vpack.c.bf16 %v268_v8, %v267_v7  ;;  %v269_v10 = vld [vmem:[#allocation8 + $0x20] sm:$0xff]  ;;  %v270_v11 = vld [vmem:[#allocation8 + $0x28] sm:$0xff]  ;;  %v271_v13 = vld [vmem:[#allocation8 + $0x30] sm:$0xff]  ;;  %671 = vset.pattern.permute.xlu0 %v827_v24  ;;  %s409_s28 = sshll.u32 %s242_s22, 4  ;;  %s396_s24 = scalar_lea.sflag [#allocation7], %s1003_s6  ;;  %s1035_s28 = int_to_ptr.vmem [resolvable:$true] %s409_s28 }
  0x5e   : > { %v574_v12 = vpack.c.bf16 %v270_v11, %v269_v10  ;;  %v272_v14 = vld [vmem:[#allocation8 + $0x38] sm:$0xff]  ;;  %v273_v16 = vld [vmem:[#allocation8 + $0x40] sm:$0xff]  ;;  %v274_v17 = vld [vmem:[#allocation8 + $0x48] sm:$0xff]  ;;  %s732_s30 = scalar_lea.vmem %s1035_s28, 128  ;;  %s828_s18 = smov [#allocation10]  }
  0x5f   : > { %569 = vmatpush3.bf16.msra.mxu0 %v568_v6  ;;  %v577_v15 = vpack.c.bf16 %v272_v14, %v271_v13  ;;  %v580_v18 = vpack.c.bf16 %v274_v17, %v273_v16  ;;  %v275_v19 = vld [vmem:[#allocation8 + $0x50] sm:$0xff]  ;;  %v276_v20 = vld [vmem:[#allocation8 + $0x58] sm:$0xff]  ;;  %v277_v22 = vld [vmem:[#allocation8 + $0x60] sm:$0xff]  ;;  %p733_p4 = scmp.ne.s32.totalorder %s1035_s28, %s732_s30  ;;  %s736_s9 = sshll.u32 %s828_s18, 4  ;;  %s737_s9 = int_to_ptr.vmem [resolvable:$false] %s736_s9 }
  0x60   : > { %570 = vmatprep.subr.bf16.mxu0 %v824_v0  ;;  %260 = vadd.xlane.f32.xlu0 %v259_v5  ;;  %v583_v21 = vpack.c.bf16 %v276_v20, %v275_v19  ;;  %v278_v23 = vld [vmem:[#allocation8 + $0x68] sm:$0xff]  ;;  %v279_v26 = vld [vmem:[#allocation8 + $0x70] sm:$0xff]  ;;  %v280_v27 = vld [vmem:[#allocation8 + $0x78] sm:$0xff]  ;;  %s738_s11 = scalar_lea.vmem %s737_s9, 256  ;;  %p739_p12 = scmp.lt.s32.totalorder %s1035_s28, %s737_s9 }
  0x61   : > { %v586_v25 = vpack.c.bf16 %v278_v23, %v277_v22  ;;  %v589_v28 = vpack.c.bf16 %v280_v27, %v279_v26  ;;  %v509_v46 = vld [vmem:[%s1084_s2] ss:$0 sm:$0xff]  ;;  %p734_p6 = pnand %p733_p4, %p950_p10  ;;  %p740_p11 = scmp.lt.s32.totalorder %s738_s11, %s732_s30 }
  0x62   : > { %v252_v29 = vld [vmem:[#allocation3] sm:$0xff]  ;;  %v258_v32 = vld [vmem:[#allocation4] sm:$0xff] }
  0x63   : > { %572 = vmatpush3.bf16.msra.mxu0 %v571_v9  ;;  %v510_v50 = vld [vmem:[%s1085_s3] ss:$0 sm:$0xff]  ;;  %p735_p8 = pneg %p734_p6  ;;  %p741_p0 = por %p740_p11, %p739_p12 }
  0x64   : > { %573 = vmatprep.subr.bf16.mxu0 %v824_v0 }
  0x65   : > { %p742_p5 = pnand %p741_p0, %p735_p8 }
  0x67   : > { %575 = vmatpush3.bf16.msra.mxu0 %v574_v12 }
  0x68   : > { %576 = vmatprep.subr.bf16.mxu0 %v824_v0 }
  0x6b   : > { %578 = vmatpush3.bf16.msra.mxu0 %v577_v15 }
  0x6c   : > { %579 = vmatprep.subr.bf16.mxu0 %v824_v0 }
  0x6f   : > { %581 = vmatpush3.bf16.msra.mxu0 %v580_v18 }
  0x70   : > { %582 = vmatprep.subr.bf16.mxu0 %v824_v0 }
  0x73   : > { %584 = vmatpush3.bf16.msra.mxu0 %v583_v21 }
  0x74   : > { %585 = vmatprep.subr.bf16.mxu0 %v824_v0 }
  0x77   : > { %587 = vmatpush3.bf16.msra.mxu0 %v586_v25 }
  0x78   : > { %588 = vmatprep.subr.bf16.mxu0 %v824_v0 }
  0x7b   : > { %590 = vmatpush3.bf16.msra.mxu0 %v589_v28 }
  0x7e   : > { %565 = vmatmul.mubr.f32.vlgmr.msra.gmra.mrb[0].mxu0 %v251_v2 }
  0xe9   : > { %v254_v30 = vpop.xlane.xlu0 %253 }
  0xea   : > { %v255_v31 = vadd.f32 %v254_v30, %v252_v29 }
  0xec   : > { %257 = vst.msk [vmem:[#allocation3] sm:$0xff] %vm248_vm0, %v255_v31 }
  0xed   : > { %v261_v33 = vpop.xlane.xlu0 %260 }
  0xee   : > { %v262_v34 = vadd.f32 %v261_v33, %v258_v32 }
  0xf0   : > { %263 = vst.msk [vmem:[#allocation4] sm:$0xff] %vm248_vm0, %v262_v34 }
  0xf3   : > { %v356_v35 = vld [vmem:[#allocation3] sm:$0xff] }
  0xf4   : > { %v357_v36 = vmul.f32 0.0078125, %v356_v35 }
  0xf6   : > { %369 = vperm.xlu1 %670, %v357_v36   ;;  %v360_v39 = vmul.f32 %v357_v36, %v357_v36 }
  0xf7   : > { %v358_v37 = vld [vmem:[#allocation4] sm:$0xff] }
  0xf8   : > { %v359_v38 = vmul.f32 0.0078125, %v358_v37 }
  0xfa   : > { %v361_v40 = vsub.f32 %v359_v38, %v360_v39 }
  0xfc   : > { %v362_v41 = vmax.f32 %v361_v40, 0.0 }
  0xfe   : > { %v363_v42 = vadd.f32 1e-05, %v362_v41 }
 0x100   : > { %672 = vrsqrt.f32 %v363_v42 }
 0x10a   : > { %v673_v43 = vpop.eup %672 }
 0x10b   : > { %382 = vperm.xlu1 %670, %v673_v43  }
 0x151   : > { %v347_v44 = vpop.f32.mrb[0].mxu0 }
 0x152   : > { %v566_v45 = vpop.f32.mrb[1].mxu0 }
 0x175   : > { %v370_v47 = vpop.permute.xlu1 %369 }
 0x176   : > { %v378_v48 = vmul.f32 %v509_v46, %v370_v47 }
 0x178   : > { %v379_v49 = vsub.f32 %v347_v44, %v378_v48 }
 0x18a   : > { %v383_v51 = vpop.permute.xlu1 %382 }
 0x18b   : > { %v385_v52 = vmul.f32 %v383_v51, %v379_v49 }
 0x18d   : > { %v393_v53 = vadd.f32 %v510_v50, %v385_v52 }
 0x18f   : > { %394 = vst [vmem:[%s242_s22] sm:$0xff] %v393_v53 }
 0x190   : > { %745 = shalt.err (!%p742_p5)
}
 0x191   : > { %s746_s6 = scalar_lea.hbm %s1033_s13, 128  ;;  %s750_s25 = scalar_lea.hbm %s1086_s4, 256 }
 0x192   : > { %p747_p9 = scmp.ne.s32.totalorder %s1033_s13, %s746_s6  ;;  %p751_p7 = scmp.lt.u32.totalorder %s1033_s13, %s1086_s4 }
 0x193   : > { %p752_p3 = scmp.lt.u32.totalorder %s750_s25, %s746_s6  ;;  %p754_p4 = scmp.lt.u32.totalorder %s746_s6, %s1033_s13 }
 0x194   : > { %p748_p1 = pnand %p747_p9, %p950_p10 }
 0x195   : > { %p753_p13 = por %p752_p3, %p751_p7 }
 0x196   : > { %p749_p2 = pneg %p748_p1 }
 0x197   : > { %p755_p6 = por %p754_p4, %p753_p13 }
 0x199   : > { %p756_p8 = pnand %p755_p6, %p749_p2 }
 0x19b   : > { %759 = shalt.err (!%p756_p8)
}
 0x19c   : > { %597 = dma.vmem_to_hbm [thread:$0]  (%p950_p10), %s1035_s28, 128, %s1033_s13, %s396_s24  }
 0x19d PF: > { %s421_s21 = sand.u32 1, %s798_s15   ;;  %p1104_p12 = scmp.ne.s32.totalorder %s1094_s26, 0 }
 0x19e   : > { %p1105_p11 = scmp.ge.s32.totalorder %s818_s20, 2  ;;  %s422_s22 = scalar_lea.sflag [#allocation7], %s421_s21 }
 0x1a0   : > { %p608_p0 = pnand %p1105_p11, %p1104_p12 }
 0x1a2   : > { %793 = dma.done.wait (!%p608_p0), %s422_s22, 128  }
 0x1a3   : > { %795 = vsyncadd (!%p608_p0), %s422_s22, 4294967168  ;;  %s21_s20 = sadd.s32 1, %s818_s20   ;;  %s1106_s15 = smov %s802_s16 }
 0x1a4   : > { %p18_p5 = scmp.ge.s32.totalorder %s21_s20, 4   ;;  %s1107_s16 = smov %s806_s17 }
 0x1a5   : > { %s1108_s17 = smov %s959_s10  ;;  %s1109_s18 = smov %s814_s19 }
 0x1a6   : > { %s1110_s19 = smov %s1112_s5  ;;  %20 = sbr.rel (!%p18_p5) target bundleno = 7 (0x7), region = 93 }
 0x1ad   :  { %427 = vsyncpa [#allocation6], 1 }
 0x1ae   :  { %429 = vsyncpa [#allocation6 + $0x1], 1 }
 0x1af   :  { %430 = vsyncpa [#allocation9], 1 }
 0x1b0   :  { %431 = vsyncpa [#allocation7], 1 }
 0x1b1   :  { %433 = vsyncpa [#allocation7 + $0x1], 1 }

// kernel: tpu_custom_call.1
= control target key start
LH: loop header
LB: loop body
LE: loop exit
PB: predicated region body
PF: predicated region fallthrough
CT: control target
= control target key end

     0   :  { %9 = vsyncpa [#allocation6], 0  ;;  %s1082_s0 = inlined_call_operand.hbm [shape: f32[16,128], index: 0, kind: input, shape index: {}]   ;;  %s1083_s1 = inlined_call_operand.hbm [shape: f32[128,128], index: 1, kind: input, shape index: {}]   ;;  %s1084_s2 = inlined_call_operand.vmem [shape: f32[1,128], index: 2, kind: input, shape index: {}]   ;;  %s1085_s3 = inlined_call_operand.vmem [shape: f32[1,128], index: 3, kind: input, shape index: {}]   ;;  %s1086_s4 = inlined_call_operand.hbm [shape: f32[16,128], index: 4, kind: output, shape index: {}]  }
   0x1   :  { %11 = vsyncpa [#allocation6 + $0x1], 0 }
   0x2   :  { %12 = vsyncpa [#allocation9], 0 }
   0x3   :  { %13 = vsyncpa [#allocation7], 0 }
   0x4   :  { %15 = vsyncpa [#allocation7 + $0x1], 0  ;;  %s854_s15 = smov 0   ;;  %s856_s16 = smov 0  }
   0x5   :  { %s858_s17 = smov 0   ;;  %s860_s18 = smov 0  }
   0x6   :  { %s862_s19 = smov 0   ;;  %s864_s20 = smov 0  }
   0x7 LB: > { %s498_s21 = sadd.s32 4294967295, %s818_s20   ;;  %s499_s22 = sadd.s32 4294967294, %s818_s20   ;;  %s818_s20 = sphi %s864_s20, %s21_s20   ;;  %s814_s19 = sphi %s862_s19, %s1110_s19   ;;  %s810_s18 = sphi %s860_s18, %s1109_s18   ;;  %s806_s17 = sphi %s858_s17, %s1108_s17   ;;  %s802_s16 = sphi %s856_s16, %s1107_s16   ;;  %s798_s15 = sphi %s854_s15, %s1106_s15  }
   0x8   : > { %p55_p0 = scmp.ne.s32.totalorder %s802_s16, %s798_s15  ;;  %p888_p1 = scmp.eq.s32.totalorder %s498_s21, 0 }
   0x9   : > { %p892_p2 = scmp.eq.s32.totalorder %s498_s21, 1  ;;  %p148_p3 = scmp.eq.s32.totalorder %s499_s22, 1 }
   0xa   : > { %s1091_s23 = scalar_select %p888_p1, 1, 0 }
   0xb   : > { %s1092_s24 = scalar_select %p892_p2, 1, 0 }
   0xc   : > { %p898_p4 = por %p888_p1, %p55_p0  ;;  %p500_p5 = scmp.ge.s32.totalorder %s818_s20, 1 }
   0xd   : > { %p903_p6 = por %p148_p3, %p55_p0  ;;  %p155_p7 = scmp.lt.s32.totalorder %s818_s20, 3 }
   0xe   : > { %s1093_s25 = scalar_select %p898_p4, 1, 0 }
   0xf   : > { %s1094_s26 = scalar_select %p903_p6, 1, 0 }
  0x10   : > { %p908_p8 = pnand %p500_p5, %p155_p7  ;;  %s820_s28 = smov [#allocation8]  }
  0x11   : > { %s167_s29 = sshll.u32 %s820_s28, 4  ;;  %s33_s5 = sadd.s32 1, %s814_s19  ;;  %s168_s29 = int_to_ptr.vmem [resolvable:$true] %s167_s29 }
  0x12   : > { %s1095_s27 = scalar_select %p908_p8, 1, 0 }
  0x13   : > { %p599_p9 = pneg %p908_p8  ;;  %s674_s8 = scalar_lea.hbm %s1083_s1, 2048 }
  0x14   : > { %p675_p12 = scmp.ne.s32.totalorder %s1083_s1, %s674_s8  ;;  %p681_p5 = scmp.lt.u32.totalorder %s674_s8, %s1083_s1 }
  0x15   : > { %p917_p11 = pnand %p599_p9, %p888_p1 }
  0x17   : > { %p676_p13 = pneg %p917_p11 }
  0x19   : > { %p677_p0 = pnand %p676_p13, %p675_p12 }
  0x1b   : > { %p678_p3 = pneg %p677_p0 }
  0x1d   : > { %p683_p7 = pnand %p681_p5, %p678_p3 }
  0x1f   : > { %686 = shalt.err (!%p683_p7)
}
  0x20   : > { %s687_s13 = scalar_lea.vmem %s168_s29, 2048  ;;  %p695_p1 = scmp.lt.s32.totalorder %s168_s29, %s168_s29 }
  0x21   : > { %p688_p9 = scmp.ne.s32.totalorder %s168_s29, %s687_s13  ;;  %p696_p4 = scmp.lt.s32.totalorder %s687_s13, %s687_s13 }
  0x23   : > { %p690_p10 = pnand %p688_p9, %p676_p13  ;;  %p697_p8 = por %p696_p4, %p695_p1 }
  0x25   : > { %p691_p6 = pneg %p690_p10 }
  0x27   : > { %p698_p2 = pnand %p697_p8, %p691_p6 }
  0x29   : > { %701 = shalt.err (!%p698_p2)
}
  0x2a   : > { %s821_s14 = smov 128   ;;  %s822_s21 = smov 8  }
  0x2b   : > { %602 = dma.hbm_to_vmem [thread:$0]  (!%p917_p11), %s1083_s1, 2048, %s168_s29, [#allocation9], %s821_s14, %s821_s14, %s822_s21  }
  0x2c   : > { %p35_p1 = scmp.ge.s32.totalorder %s33_s5, 2  ;;  %s42_s6 = sadd.s32 1, %s806_s17 }
  0x2d   : > { %p49_p2 = scmp.ne.s32.totalorder %s806_s17, %s802_s16  ;;  %p50_p4 = scmp.eq.s32.totalorder %s818_s20, 0 }
  0x2e   : > { %s1112_s5 = smov (%p35_p1, %s33_s5), 0  ;;  %p1098_p8 = scmp.ne.s32.totalorder %s1092_s24, 0 }
  0x2f   : > { %p944_p6 = por %p50_p4, %p49_p2  ;;  %s37_s30 = ssub.s32 %s814_s19, %s1112_s5 }
  0x30   : > { %p950_p10 = por %p1098_p8, %p49_p2  ;;  %p612_p12 = scmp.lt.s32.totalorder %s818_s20, 2 }
  0x31   : > { %p40_p11 = scmp.eq.s32.totalorder %s37_s30, 0  ;;  %s187_s29 = sand.u32 1, %s806_s17  }
  0x32   : > { %s503_s9 = sshll.u32 %s187_s29, 3  ;;  %s504_s11 = sshll.u32 %s814_s19, 7 }
  0x33   : > { %s959_s10 = scalar_select %p40_p11, %s806_s17, %s42_s6  }
  0x34   : > { %s965_s14 = scalar_lea.hbm %s1082_s0, %s504_s11  ;;  %s191_s24 = scalar_lea.vmem [#allocation5], %s503_s9 }
  0x35   : > { %s199_s21 = sshll.u32 %s191_s24, 4  ;;  %p971_p13 = pnand %p612_p12, %p944_p6  ;;  %s967_s21 = int_to_ptr.vmem [resolvable:$true] %s199_s21 }
  0x36   : > { %s188_s28 = scalar_lea.sflag [#allocation6], %s187_s29  ;;  %s702_s6 = scalar_lea.hbm %s965_s14, 128 }
  0x37   : > { %p703_p0 = scmp.ne.s32.totalorder %s965_s14, %s702_s6  ;;  %p704_p3 = pneg %p971_p13 }
  0x38   : > { %s707_s11 = scalar_lea.hbm %s1082_s0, 256  ;;  %p708_p9 = scmp.lt.u32.totalorder %s965_s14, %s1082_s0 }
  0x39   : > { %p705_p5 = pnand %p704_p3, %p703_p0  ;;  %p709_p1 = scmp.lt.u32.totalorder %s707_s11, %s702_s6 }
  0x3a   : > { %p711_p4 = scmp.lt.u32.totalorder %s702_s6, %s965_s14 }
  0x3b   : > { %p706_p7 = pneg %p705_p5  ;;  %p710_p2 = por %p709_p1, %p708_p9 }
  0x3d   : > { %p712_p6 = por %p711_p4, %p710_p2 }
  0x3f   : > { %p713_p8 = pnand %p712_p6, %p706_p7 }
  0x41   : > { %716 = shalt.err (!%p713_p8)
}
  0x42   : > { %s717_s29 = scalar_lea.vmem %s967_s21, 128  ;;  %s823_s13 = smov [#allocation5]  }
  0x43   : > { %p718_p12 = scmp.ne.s32.totalorder %s967_s21, %s717_s29  ;;  %s722_s24 = sshll.u32 %s823_s13, 4  ;;  %s723_s24 = int_to_ptr.vmem [resolvable:$false] %s722_s24 }
  0x44   : > { %s724_s30 = scalar_lea.vmem %s723_s24, 256  ;;  %p725_p5 = scmp.lt.s32.totalorder %s967_s21, %s723_s24 }
  0x45   : > { %p720_p11 = pnand %p718_p12, %p704_p3  ;;  %p726_p9 = scmp.lt.s32.totalorder %s724_s30, %s717_s29 }
  0x47   : > { %p721_p0 = pneg %p720_p11  ;;  %p727_p1 = por %p726_p9, %p725_p5 }
  0x49   : > { %p728_p2 = pnand %p727_p1, %p721_p0 }
  0x4b   : > { %731 = shalt.err (!%p728_p2)
}
  0x4c   : > { %606 = dma.hbm_to_vmem [thread:$0]  (!%p971_p13), %s965_s14, 128, %s967_s21, %s188_s28  }
  0x4d   : > { %p1101_p7 = scmp.ne.s32.totalorder %s1095_s27, 0 }
  0x4e   : > { %s1003_s6 = sand.u32 (!%p1101_p7), 1, %s802_s16   ;;  %p1102_p3 = scmp.ne.s32.totalorder (!%p1101_p7), %s1093_s25, 0 }
  0x4f   : > { %208 = sbr.rel (%p1101_p7) target bundleno = 413 (0x19d), region = 36  ;;  %s506_s9 = sshll.u32 (!%p1101_p7), %s1003_s6, 3 }
  0x50   : > { %s211_s11 = scalar_lea.sflag (!%p1101_p7), [#allocation6], %s1003_s6  ;;  %s214_s7 = scalar_lea.vmem (!%p1101_p7), [#allocation5], %s506_s9 }
  0x56   : > { %785 = dma.done.wait (%p1102_p3), %s211_s11, 128  }
  0x57   : > { %787 = vsyncadd (%p1102_p3), %s211_s11, 4294967168  ;;  %p1103_p13 = scmp.ne.s32.totalorder %s1091_s23, 0 }
  0x59   : > { %789 = dma.done.wait (%p1103_p13), [#allocation9], 2048  }
  0x5a   : > { %791 = vsyncadd (%p1103_p13), [#allocation9], 4294965248  ;;  %vm248_vm0 = vcmask 7168   ;;  %v824_v0 = vmov 0.0|0.0   ;;  %v825_v1 = vmov 0.0   ;;  %vm826_vm1 = vmmov 0  }
  0x5b   : > { %567 = vmatprep.subr.bf16.mxu0 %v824_v0  ;;  %249 = vst.msk [vmem:[#allocation3] sm:$0xff] %vm248_vm0, %v825_v1  ;;  %250 = vst.msk [vmem:[#allocation4] sm:$0xff] %vm248_vm0, %v825_v1  ;;  %564 = vmatprep.mubr.msk.f32.mxu0 %vm826_vm1, %v825_v1  ;;  %v251_v2 = vld [vmem:[%s214_s7] sm:$0xff]  ;;  %v265_v3 = vld [vmem:[#allocation8] sm:$0xff]  ;;  %v827_v24 = vmov 0   ;;  %s512_s21 = sshll.u32 %s810_s18, 7 }
  0x5c   : > { %v266_v4 = vld [vmem:[#allocation8 + $0x8] sm:$0xff]  ;;  %253 = vadd.xlane.f32.xlu0 %v251_v2  ;;  %v259_v5 = vmul.f32 %v251_v2, %v251_v2  ;;  %v267_v7 = vld [vmem:[#allocation8 + $0x10] sm:$0xff]  ;;  %v268_v8 = vld [vmem:[#allocation8 + $0x18] sm:$0xff]  ;;  %670 = vset.pattern.permute.xlu1 %v827_v24  ;;  %s242_s22 = scalar_lea.vmem [#allocation10], %s506_s9  ;;  %s1033_s13 = scalar_lea.hbm %s1086_s4, %s512_s21 }
  0x5d   : > { %v568_v6 = vpack.c.bf16 %v266_v4, %v265_v3  ;;  %v571_v9 = vpack.c.bf16 %v268_v8, %v267_v7  ;;  %v269_v10 = vld [vmem:[#allocation8 + $0x20] sm:$0xff]  ;;  %v270_v11 = vld [vmem:[#allocation8 + $0x28] sm:$0xff]  ;;  %v271_v13 = vld [vmem:[#allocation8 + $0x30] sm:$0xff]  ;;  %671 = vset.pattern.permute.xlu0 %v827_v24  ;;  %s409_s28 = sshll.u32 %s242_s22, 4  ;;  %s396_s24 = scalar_lea.sflag [#allocation7], %s1003_s6  ;;  %s1035_s28 = int_to_ptr.vmem [resolvable:$true] %s409_s28 }
  0x5e   : > { %v574_v12 = vpack.c.bf16 %v270_v11, %v269_v10  ;;  %v272_v14 = vld [vmem:[#allocation8 + $0x38] sm:$0xff]  ;;  %v273_v16 = vld [vmem:[#allocation8 + $0x40] sm:$0xff]  ;;  %v274_v17 = vld [vmem:[#allocation8 + $0x48] sm:$0xff]  ;;  %s732_s30 = scalar_lea.vmem %s1035_s28, 128  ;;  %s828_s18 = smov [#allocation10]  }
  0x5f   : > { %569 = vmatpush3.bf16.msra.mxu0 %v568_v6  ;;  %v577_v15 = vpack.c.bf16 %v272_v14, %v271_v13  ;;  %v580_v18 = vpack.c.bf16 %v274_v17, %v273_v16  ;;  %v275_v19 = vld [vmem:[#allocation8 + $0x50] sm:$0xff]  ;;  %v276_v20 = vld [vmem:[#allocation8 + $0x58] sm:$0xff]  ;;  %v277_v22 = vld [vmem:[#allocation8 + $0x60] sm:$0xff]  ;;  %p733_p4 = scmp.ne.s32.totalorder %s1035_s28, %s732_s30  ;;  %s736_s9 = sshll.u32 %s828_s18, 4  ;;  %s737_s9 = int_to_ptr.vmem [resolvable:$false] %s736_s9 }
  0x60   : > { %570 = vmatprep.subr.bf16.mxu0 %v824_v0  ;;  %260 = vadd.xlane.f32.xlu0 %v259_v5  ;;  %v583_v21 = vpack.c.bf16 %v276_v20, %v275_v19  ;;  %v278_v23 = vld [vmem:[#allocation8 + $0x68] sm:$0xff]  ;;  %v279_v26 = vld [vmem:[#allocation8 + $0x70] sm:$0xff]  ;;  %v280_v27 = vld [vmem:[#allocation8 + $0x78] sm:$0xff]  ;;  %s738_s11 = scalar_lea.vmem %s737_s9, 256  ;;  %p739_p12 = scmp.lt.s32.totalorder %s1035_s28, %s737_s9 }
  0x61   : > { %v586_v25 = vpack.c.bf16 %v278_v23, %v277_v22  ;;  %v589_v28 = vpack.c.bf16 %v280_v27, %v279_v26  ;;  %v509_v46 = vld [vmem:[%s1084_s2] ss:$0 sm:$0xff]  ;;  %p734_p6 = pnand %p733_p4, %p950_p10  ;;  %p740_p11 = scmp.lt.s32.totalorder %s738_s11, %s732_s30 }
  0x62   : > { %v252_v29 = vld [vmem:[#allocation3] sm:$0xff]  ;;  %v258_v32 = vld [vmem:[#allocation4] sm:$0xff] }
  0x63   : > { %572 = vmatpush3.bf16.msra.mxu0 %v571_v9  ;;  %v510_v50 = vld [vmem:[%s1085_s3] ss:$0 sm:$0xff]  ;;  %p735_p8 = pneg %p734_p6  ;;  %p741_p0 = por %p740_p11, %p739_p12 }
  0x64   : > { %573 = vmatprep.subr.bf16.mxu0 %v824_v0 }
  0x65   : > { %p742_p5 = pnand %p741_p0, %p735_p8 }
  0x67   : > { %575 = vmatpush3.bf16.msra.mxu0 %v574_v12 }
  0x68   : > { %576 = vmatprep.subr.bf16.mxu0 %v824_v0 }
  0x6b   : > { %578 = vmatpush3.bf16.msra.mxu0 %v577_v15 }
  0x6c   : > { %579 = vmatprep.subr.bf16.mxu0 %v824_v0 }
  0x6f   : > { %581 = vmatpush3.bf16.msra.mxu0 %v580_v18 }
  0x70   : > { %582 = vmatprep.subr.bf16.mxu0 %v824_v0 }
  0x73   : > { %584 = vmatpush3.bf16.msra.mxu0 %v583_v21 }
  0x74   : > { %585 = vmatprep.subr.bf16.mxu0 %v824_v0 }
  0x77   : > { %587 = vmatpush3.bf16.msra.mxu0 %v586_v25 }
  0x78   : > { %588 = vmatprep.subr.bf16.mxu0 %v824_v0 }
  0x7b   : > { %590 = vmatpush3.bf16.msra.mxu0 %v589_v28 }
  0x7e   : > { %565 = vmatmul.mubr.f32.vlgmr.msra.gmra.mrb[0].mxu0 %v251_v2 }
  0xe9   : > { %v254_v30 = vpop.xlane.xlu0 %253 }
  0xea   : > { %v255_v31 = vadd.f32 %v254_v30, %v252_v29 }
  0xec   : > { %257 = vst.msk [vmem:[#allocation3] sm:$0xff] %vm248_vm0, %v255_v31 }
  0xed   : > { %v261_v33 = vpop.xlane.xlu0 %260 }
  0xee   : > { %v262_v34 = vadd.f32 %v261_v33, %v258_v32 }
  0xf0   : > { %263 = vst.msk [vmem:[#allocation4] sm:$0xff] %vm248_vm0, %v262_v34 }
  0xf3   : > { %v356_v35 = vld [vmem:[#allocation3] sm:$0xff] }
  0xf4   : > { %v357_v36 = vmul.f32 0.0078125, %v356_v35 }
  0xf6   : > { %369 = vperm.xlu1 %670, %v357_v36   ;;  %v360_v39 = vmul.f32 %v357_v36, %v357_v36 }
  0xf7   : > { %v358_v37 = vld [vmem:[#allocation4] sm:$0xff] }
  0xf8   : > { %v359_v38 = vmul.f32 0.0078125, %v358_v37 }
  0xfa   : > { %v361_v40 = vsub.f32 %v359_v38, %v360_v39 }
  0xfc   : > { %v362_v41 = vmax.f32 %v361_v40, 0.0 }
  0xfe   : > { %v363_v42 = vadd.f32 1e-05, %v362_v41 }
 0x100   : > { %672 = vrsqrt.f32 %v363_v42 }
 0x10a   : > { %v673_v43 = vpop.eup %672 }
 0x10b   : > { %382 = vperm.xlu1 %670, %v673_v43  }
 0x151   : > { %v347_v44 = vpop.f32.mrb[0].mxu0 }
 0x152   : > { %v566_v45 = vpop.f32.mrb[1].mxu0 }
 0x175   : > { %v370_v47 = vpop.permute.xlu1 %369 }
 0x176   : > { %v378_v48 = vmul.f32 %v509_v46, %v370_v47 }
 0x178   : > { %v379_v49 = vsub.f32 %v347_v44, %v378_v48 }
 0x18a   : > { %v383_v51 = vpop.permute.xlu1 %382 }
 0x18b   : > { %v385_v52 = vmul.f32 %v383_v51, %v379_v49 }
 0x18d   : > { %v393_v53 = vadd.f32 %v510_v50, %v385_v52 }
 0x18f   : > { %394 = vst [vmem:[%s242_s22] sm:$0xff] %v393_v53 }
 0x190   : > { %745 = shalt.err (!%p742_p5)
}
 0x191   : > { %s746_s6 = scalar_lea.hbm %s1033_s13, 128  ;;  %s750_s25 = scalar_lea.hbm %s1086_s4, 256 }
 0x192   : > { %p747_p9 = scmp.ne.s32.totalorder %s1033_s13, %s746_s6  ;;  %p751_p7 = scmp.lt.u32.totalorder %s1033_s13, %s1086_s4 }
 0x193   : > { %p752_p3 = scmp.lt.u32.totalorder %s750_s25, %s746_s6  ;;  %p754_p4 = scmp.lt.u32.totalorder %s746_s6, %s1033_s13 }
 0x194   : > { %p748_p1 = pnand %p747_p9, %p950_p10 }
 0x195   : > { %p753_p13 = por %p752_p3, %p751_p7 }
 0x196   : > { %p749_p2 = pneg %p748_p1 }
 0x197   : > { %p755_p6 = por %p754_p4, %p753_p13 }
 0x199   : > { %p756_p8 = pnand %p755_p6, %p749_p2 }
 0x19b   : > { %759 = shalt.err (!%p756_p8)
}
 0x19c   : > { %597 = dma.vmem_to_hbm [thread:$0]  (%p950_p10), %s1035_s28, 128, %s1033_s13, %s396_s24  }
 0x19d PF: > { %s421_s21 = sand.u32 1, %s798_s15   ;;  %p1104_p12 = scmp.ne.s32.totalorder %s1094_s26, 0 }
 0x19e   : > { %p1105_p11 = scmp.ge.s32.totalorder %s818_s20, 2  ;;  %s422_s22 = scalar_lea.sflag [#allocation7], %s421_s21 }
 0x1a0   : > { %p608_p0 = pnand %p1105_p11, %p1104_p12 }
 0x1a2   : > { %793 = dma.done.wait (!%p608_p0), %s422_s22, 128  }
 0x1a3   : > { %795 = vsyncadd (!%p608_p0), %s422_s22, 4294967168  ;;  %s21_s20 = sadd.s32 1, %s818_s20   ;;  %s1106_s15 = smov %s802_s16 }
 0x1a4   : > { %p18_p5 = scmp.ge.s32.totalorder %s21_s20, 4   ;;  %s1107_s16 = smov %s806_s17 }
 0x1a5   : > { %s1108_s17 = smov %s959_s10  ;;  %s1109_s18 = smov %s814_s19 }
 0x1a6   : > { %s1110_s19 = smov %s1112_s5  ;;  %20 = sbr.rel (!%p18_p5) target bundleno = 7 (0x7), region = 93 }
 0x1ad   :  { %427 = vsyncpa [#allocation6], 1 }
 0x1ae   :  { %429 = vsyncpa [#allocation6 + $0x1], 1 }
 0x1af   :  { %430 = vsyncpa [#allocation9], 1 }
 0x1b0   :  { %431 = vsyncpa [#allocation7], 1 }
 0x1b1   :  { %433 = vsyncpa [#allocation7 + $0x1], 1 }

</bundles_post_ra>
